<compile_context>
chip_gen: v5e
topology: v5e:2x2
jax: 0.10.0
libtpu: 0.0.40
codegen_flags: <defaults>
</compile_context>

<pallas_src>
import jax
import jax.numpy as jnp
from jax import lax
from jax.experimental import pallas as pl
from jax.experimental.pallas import tpu as pltpu


def _proj_head_kernel(x_ref, w1_ref, b1_ref, w2_ref, b2_ref, o_ref):
    # x_ref: (C_in, TP) channel-major slab of pixels (pixels on the lane axis).
    x = x_ref[...]

    # --- 1x1 conv #1 with BatchNorm pre-folded: (C_in, C_in) @ (C_in, TP) ---
    h = jnp.dot(w1_ref[...], x, preferred_element_type=jnp.float32)
    h = jnp.maximum(h + b1_ref[...], 0.0)            # bias + ReLU

    # --- 1x1 conv #2: (proj_dim, C_in) @ (C_in, TP) ---
    y = jnp.dot(w2_ref[...], h.astype(w2_ref.dtype),
                preferred_element_type=jnp.float32)
    y = y + b2_ref[...]

    # --- L2 normalize over the channel (sublane) axis ---
    # rsqrt(max(ss, eps^2)) == 1 / max(||y||, 1e-12)  (torch.normalize eps)
    ss = jnp.sum(y * y, axis=0, keepdims=True)       # (1, TP)
    inv = lax.rsqrt(jnp.maximum(ss, 1e-24))
    o_ref[...] = (y * inv).astype(o_ref.dtype)


def projection_head_forward(x_nchw, params, *, tile_pixels=1024):
    """x_nchw: (N, C_in, H, W). params in torch layout (see init_params).
    Returns (N, proj_dim, H, W)."""
    w1, b1, gamma, beta, mean, var, eps, w2, b2 = params
    N, C_in, H, W = x_nchw.shape
    proj_dim = w2.shape[0]
    dtype = x_nchw.dtype

    # Fold BatchNorm (inference) into conv1:  scale*(W1 x + b1) + shift
    scale = gamma / jnp.sqrt(var + eps)                        # (C_in,)
    shift = beta - mean * scale
    w1f = (w1 * scale[:, None]).astype(dtype)                  # (C_in, C_in) [out, in]
    b1f = ((b1 * scale + shift)[:, None]).astype(jnp.float32)  # (C_in, 1)
    w2c = w2.astype(dtype)                                     # (proj_dim, C_in)
    b2c = (b2[:, None]).astype(jnp.float32)                    # (proj_dim, 1)

    # NCHW -> (N, C_in, H*W): pure reshape, no HBM transpose.
    P = H * W
    x = x_nchw.reshape(N, C_in, P)

    # Pick a large lane-dense pixel tile and pad P up to it (no hard assert).
    tp = max(128, min(tile_pixels, pl.cdiv(P, 128) * 128))
    P_pad = pl.cdiv(P, tp) * tp
    if P_pad != P:
        x = jnp.pad(x, ((0, 0), (0, 0), (0, P_pad - P)))

    grid = (N, P_pad // tp)
    full = lambda shape: pl.BlockSpec(shape, lambda n, i: (0, 0))

    out = pl.pallas_call(
        _proj_head_kernel,
        out_shape=jax.ShapeDtypeStruct((N, proj_dim, P_pad), dtype),
        grid_spec=pltpu.PrefetchScalarGridSpec(
            num_scalar_prefetch=0,
            grid=grid,
            in_specs=[
                # batch dim squeezed out of the kernel ref
                pl.BlockSpec((None, C_in, tp), lambda n, i: (n, 0, i)),
                full((C_in, C_in)),       # w1 (BN folded)
                full((C_in, 1)),          # b1 (BN folded)
                full((proj_dim, C_in)),   # w2
                full((proj_dim, 1)),      # b2
            ],
            out_specs=pl.BlockSpec((None, proj_dim, tp),
                                   lambda n, i: (n, 0, i)),
        ),
        compiler_params=pltpu.CompilerParams(
            dimension_semantics=("parallel", "parallel")),
    )(x, w1f, b1f, w2c, b2c)

    if P_pad != P:
        out = out[:, :, :P]
    return out.reshape(N, proj_dim, H, W)


def init_params(key, dim_in, proj_dim):
    """Torch-layout parameters: conv weights are (out, in)."""
    ks = jax.random.split(key, 8)
    w1 = 0.05 * jax.random.normal(ks[0], (dim_in, dim_in), jnp.float32)
    b1 = 0.01 * jax.random.normal(ks[1], (dim_in,), jnp.float32)
    gamma = 1.0 + 0.1 * jax.random.normal(ks[2], (dim_in,), jnp.float32)
    beta = 0.1 * jax.random.normal(ks[3], (dim_in,), jnp.float32)
    mean = 0.05 * jax.random.normal(ks[4], (dim_in,), jnp.float32)
    var = jnp.abs(1.0 + 0.1 * jax.random.normal(ks[5], (dim_in,), jnp.float32))
    eps = 1e-5
    w2 = 0.05 * jax.random.normal(ks[6], (proj_dim, dim_in), jnp.float32)
    b2 = 0.01 * jax.random.normal(ks[7], (proj_dim,), jnp.float32)
    return (w1, b1, gamma, beta, mean, var, eps, w2, b2)


def reference_forward(x_nchw, params):
    w1, b1, gamma, beta, mean, var, eps, w2, b2 = params
    N, C, H, W = x_nchw.shape
    x = jnp.transpose(x_nchw, (0, 2, 3, 1)).reshape(-1, C)
    h = x @ w1.T + b1
    h = (h - mean) / jnp.sqrt(var + eps) * gamma + beta
    h = jnp.maximum(h, 0.0)
    y = h @ w2.T + b2
    n = jnp.sqrt(jnp.sum(y * y, axis=-1, keepdims=True))
    y = y / jnp.maximum(n, 1e-12)
    return jnp.transpose(y.reshape(N, H, W, -1), (0, 3, 1, 2))


if __name__ == "__main__":
    key = jax.random.PRNGKey(0)
    k_x, k_p = jax.random.split(key)

    N, C_in, H, W = 2, 32, 16, 16
    proj_dim = 64

    x = jax.random.normal(k_x, (N, C_in, H, W), jnp.float32)
    params = init_params(k_p, C_in, proj_dim)

    out = jax.block_until_ready(projection_head_forward(x, params))
    ref = reference_forward(x, params)

    assert out.shape == (N, proj_dim, H, W)
    assert jnp.allclose(out, ref, atol=1e-5, rtol=1e-5), \
        float(jnp.max(jnp.abs(out - ref)))

    print("KERNEL_OK")
</pallas_src>

<mosaic_0001>
module attributes {stable_mosaic.version = 11 : i64} {
  func.func @_proj_head_kernel(%arg0: i32, %arg1: i32, %arg2: memref<1x32x256xf32, #tpu.memory_space<vmem>>, %arg3: memref<32x32xf32, #tpu.memory_space<vmem>>, %arg4: memref<32x1xf32, #tpu.memory_space<vmem>>, %arg5: memref<64x32xf32, #tpu.memory_space<vmem>>, %arg6: memref<64x1xf32, #tpu.memory_space<vmem>>, %arg7: memref<1x64x256xf32, #tpu.memory_space<vmem>>) attributes {dimension_semantics = [#tpu.dimension_semantics<parallel>, #tpu.dimension_semantics<parallel>], iteration_bounds = array<i64: 2, 1>, scalar_prefetch = 0 : i64, scratch_operands = 0 : i64, tpu.core_type = #tpu.core_type<tc>, window_params = [{transform_indices = @transform_0, window_bounds = array<i64: 1, 32, 256>}, {pipeline_mode = #tpu.pipeline_mode<synchronous>, transform_indices = @transform_1, window_bounds = array<i64: 32, 32>}, {pipeline_mode = #tpu.pipeline_mode<synchronous>, transform_indices = @transform_2, window_bounds = array<i64: 32, 1>}, {pipeline_mode = #tpu.pipeline_mode<synchronous>, transform_indices = @transform_3, window_bounds = array<i64: 64, 32>}, {pipeline_mode = #tpu.pipeline_mode<synchronous>, transform_indices = @transform_4, window_bounds = array<i64: 64, 1>}, {transform_indices = @transform_5, window_bounds = array<i64: 1, 64, 256>}]} {
    %c0 = arith.constant 0 : index
    %c0_0 = arith.constant 0 : index
    %c0_1 = arith.constant 0 : index
    %0 = vector.load %arg2[%c0, %c0_0, %c0_1] : memref<1x32x256xf32, #tpu.memory_space<vmem>>, vector<1x32x256xf32>
    %1 = vector.shape_cast %0 : vector<1x32x256xf32> to vector<32x256xf32>
    %c0_2 = arith.constant 0 : index
    %c0_3 = arith.constant 0 : index
    %2 = vector.load %arg3[%c0_2, %c0_3] : memref<32x32xf32, #tpu.memory_space<vmem>>, vector<32x32xf32>
    %cst = arith.constant dense<0.000000e+00> : vector<32x256xf32>
    %3 = tpu.matmul %2, %1, %cst {dimension_numbers = #tpu.dot_dimension_numbers<[1], [0], [0], [1], [0, 0, 1, 1], [], []>} : vector<32x32xf32>, vector<32x256xf32>, vector<32x256xf32> -> vector<32x256xf32>
    %c0_4 = arith.constant 0 : index
    %c0_5 = arith.constant 0 : index
    %4 = vector.load %arg4[%c0_4, %c0_5] : memref<32x1xf32, #tpu.memory_space<vmem>>, vector<32x1xf32>
    %5 = vector.broadcast %4 : vector<32x1xf32> to vector<32x256xf32>
    %6 = arith.addf %3, %5 : vector<32x256xf32>
    %cst_6 = arith.constant 0.000000e+00 : f32
    %7 = vector.broadcast %cst_6 : f32 to vector<32x256xf32>
    %8 = arith.maximumf %6, %7 : vector<32x256xf32>
    %c0_7 = arith.constant 0 : index
    %c0_8 = arith.constant 0 : index
    %9 = vector.load %arg5[%c0_7, %c0_8] : memref<64x32xf32, #tpu.memory_space<vmem>>, vector<64x32xf32>
    %cst_9 = arith.constant dense<0.000000e+00> : vector<64x256xf32>
    %10 = tpu.matmul %9, %8, %cst_9 {dimension_numbers = #tpu.dot_dimension_numbers<[1], [0], [0], [1], [0, 0, 1, 1], [], []>} : vector<64x32xf32>, vector<32x256xf32>, vector<64x256xf32> -> vector<64x256xf32>
    %c0_10 = arith.constant 0 : index
    %c0_11 = arith.constant 0 : index
    %11 = vector.load %arg6[%c0_10, %c0_11] : memref<64x1xf32, #tpu.memory_space<vmem>>, vector<64x1xf32>
    %12 = vector.broadcast %11 : vector<64x1xf32> to vector<64x256xf32>
    %13 = arith.addf %10, %12 : vector<64x256xf32>
    %14 = arith.mulf %13, %13 : vector<64x256xf32>
    %cst_12 = arith.constant dense<0.000000e+00> : vector<256xf32>
    %15 = vector.multi_reduction <add>, %14, %cst_12 [0] : vector<64x256xf32> to vector<256xf32>
    %16 = vector.shape_cast %15 : vector<256xf32> to vector<1x256xf32>
    %cst_13 = arith.constant 1.000000e-24 : f32
    %17 = vector.broadcast %cst_13 : f32 to vector<1x256xf32>
    %18 = arith.maximumf %16, %17 : vector<1x256xf32>
    %19 = math.rsqrt %18 : vector<1x256xf32>
    %20 = vector.broadcast %19 : vector<1x256xf32> to vector<64x256xf32>
    %21 = arith.mulf %13, %20 : vector<64x256xf32>
    %c0_14 = arith.constant 0 : index
    %c0_15 = arith.constant 0 : index
    %c0_16 = arith.constant 0 : index
    %22 = vector.load %arg7[%c0_14, %c0_15, %c0_16] : memref<1x64x256xf32, #tpu.memory_space<vmem>>, vector<1x64x256xf32>
    %23 = vector.shape_cast %22 : vector<1x64x256xf32> to vector<64x256xf32>
    %24 = vector.shape_cast %21 : vector<64x256xf32> to vector<1x64x256xf32>
    tpu.vector_store %arg7[%c0_14, %c0_15, %c0_16], %24 {strides = array<i32>} : memref<1x64x256xf32, #tpu.memory_space<vmem>>, vector<1x64x256xf32>,
    return
  }
  func.func @transform_0(%arg0: i32, %arg1: i32) -> (i32, i32, i32) {
    %c0_i32 = arith.constant 0 : i32
    %c0_i32_0 = arith.constant 0 : i32
    return %arg0, %c0_i32, %arg1 : i32, i32, i32
  }
  func.func @transform_1(%arg0: i32, %arg1: i32) -> (i32, i32) {
    %c0_i32 = arith.constant 0 : i32
    %c0_i32_0 = arith.constant 0 : i32
    %c0_i32_1 = arith.constant 0 : i32
    return %c0_i32, %c0_i32_0 : i32, i32
  }
  func.func @transform_2(%arg0: i32, %arg1: i32) -> (i32, i32) {
    %c0_i32 = arith.constant 0 : i32
    %c0_i32_0 = arith.constant 0 : i32
    %c0_i32_1 = arith.constant 0 : i32
    return %c0_i32, %c0_i32_0 : i32, i32
  }
  func.func @transform_3(%arg0: i32, %arg1: i32) -> (i32, i32) {
    %c0_i32 = arith.constant 0 : i32
    %c0_i32_0 = arith.constant 0 : i32
    %c0_i32_1 = arith.constant 0 : i32
    return %c0_i32, %c0_i32_0 : i32, i32
  }
  func.func @transform_4(%arg0: i32, %arg1: i32) -> (i32, i32) {
    %c0_i32 = arith.constant 0 : i32
    %c0_i32_0 = arith.constant 0 : i32
    %c0_i32_1 = arith.constant 0 : i32
    return %c0_i32, %c0_i32_0 : i32, i32
  }
  func.func @transform_5(%arg0: i32, %arg1: i32) -> (i32, i32, i32) {
    %c0_i32 = arith.constant 0 : i32
    %c0_i32_0 = arith.constant 0 : i32
    return %arg0, %c0_i32, %arg1 : i32, i32, i32
  }
}

</mosaic_0001>

<bundles_post_ra>
// kernel: tpu_custom_call.1
= control target key start
LH: loop header
LB: loop body
LE: loop exit
PB: predicated region body
PF: predicated region fallthrough
CT: control target
= control target key end

     0   :  { %10 = vsyncpa [#allocation3], 0  ;;  %s1240_s0 = inlined_call_operand.vmem [shape: f32[2,32,256], index: 0, kind: input, shape index: {}]   ;;  %s1241_s1 = inlined_call_operand.vmem [shape: f32[32,32], index: 1, kind: input, shape index: {}]   ;;  %s1242_s2 = inlined_call_operand.vmem [shape: f32[32,1], index: 2, kind: input, shape index: {}]   ;;  %s1243_s3 = inlined_call_operand.vmem [shape: f32[64,32], index: 3, kind: input, shape index: {}]   ;;  %s1244_s4 = inlined_call_operand.vmem [shape: f32[64,1], index: 4, kind: input, shape index: {}]   ;;  %s1245_s5 = inlined_call_operand.hbm [shape: f32[2,64,256], index: 5, kind: output, shape index: {}]  }
   0x1   :  { %12 = vsyncpa [#allocation3 + $0x1], 0  ;;  %s949_s18 = smov 0   ;;  %s951_s19 = smov 0  }
   0x2   :  { %s953_s20 = smov 0   ;;  %s955_s21 = smov 0  }
   0x3   :  { %s957_s22 = smov 0   ;;  %s959_s23 = smov 0  }
   0x4 LB: > { %s724_s24 = sadd.s32 4294967295, %s914_s23   ;;  %s725_s25 = sadd.s32 4294967294, %s914_s23   ;;  %s914_s23 = sphi %s959_s23, %s18_s23   ;;  %s910_s22 = sphi %s957_s22, %s1252_s22   ;;  %s906_s21 = sphi %s955_s21, %s1251_s21   ;;  %s902_s20 = sphi %s953_s20, %s1250_s20   ;;  %s898_s19 = sphi %s951_s19, %s1249_s19   ;;  %s894_s18 = sphi %s949_s18, %s1248_s18  }
   0x5   : > { %s30_s26 = sadd.s32 1, %s910_s22  ;;  %s151_s27 = sadd.s32 1, %s902_s20 }
   0x6   : > { %p32_p0 = scmp.ge.s32.totalorder %s30_s26, 2  ;;  %p161_p1 = scmp.ne.s32.totalorder %s902_s20, %s898_s19 }
   0x7   : > { %p162_p2 = scmp.eq.s32.totalorder %s724_s24, 1  ;;  %p167_p3 = scmp.ne.s32.totalorder %s898_s19, %s894_s18 }
   0x8   : > { %s1254_s26 = smov (%p32_p0, %s30_s26), 0  ;;  %p168_p5 = scmp.eq.s32.totalorder %s725_s25, 1 }
   0x9   : > { %p989_p4 = por %p162_p2, %p161_p1  ;;  %s146_s29 = ssub.s32 %s910_s22, %s1254_s26 }
   0xa   : > { %p728_p6 = scmp.ge.s32.totalorder %s914_s23, 1  ;;  %p149_p7 = scmp.eq.s32.totalorder %s146_s29, 0 }
   0xb   : > { %p996_p8 = por %p168_p5, %p167_p3  ;;  %p211_p9 = scmp.lt.s32.totalorder %s914_s23, 3 }
   0xc   : > { %s1002_s6 = scalar_select %p149_p7, %s902_s20, %s151_s27  }
   0xd   : > { %p212_p10 = pnand %p728_p6, %p211_p9 }
   0xe   : > { %p244_p11 = scmp.lt.s32.totalorder (!%p212_p10), %s906_s21, 1  ;;  %s762_s24 = sshll.u32 (!%p212_p10), %s906_s21, 7 }
   0xf   : > { %215 = sbr.rel (%p212_p10) target bundleno = 425 (0x1a9), region = 40  ;;  %s641_s29 = scalar_lea.hbm (!%p212_p10), %s1245_s5, %s762_s24 }
  0x10   : > { %s644_s7 = sshll.u32 (!%p212_p10), %s641_s29, 4  ;;  %s856_s13 = scalar_lea.hbm (!%p212_p10), %s1245_s5, 256  ;;  %s645_s7 = int_to_ptr.hbm [resolvable:$true] %s644_s7 }
  0x11   : > { %s850_s9 = sshra.s32 (!%p212_p10), %s645_s7, 4  ;;  %s851_s9 = int_to_ptr.hbm [resolvable:$true] %s850_s9 }
  0x12   : > { %s852_s10 = scalar_lea.hbm (!%p212_p10), %s851_s9, 128  ;;  %p857_p1 = scmp.lt.s32.totalorder (!%p212_p10), %s851_s9, %s1245_s5 }
  0x13   : > { %p853_p12 = scmp.ne.s32.totalorder (!%p212_p10), %s851_s9, %s852_s10  ;;  %p858_p2 = scmp.lt.s32.totalorder (!%p212_p10), %s856_s13, %s852_s10 }
  0x14   : > { %v267_v0 = vld [vmem:[%s1242_s2 + $0x8] sm:$0xff]  ;;  %v269_v1 = vld [vmem:[%s1242_s2 + $0x18] sm:$0xff]  ;;  %v916_v2 = vmov 0   ;;  %s245_s11 = scalar_select %p244_p11, %s906_s21, 1  ;;  %v266_v7 = vld [vmem:[%s1242_s2] sm:$0xff]  ;;  %vm290_vm0 = vcmask 261120  }
  0x15   : > { %830 = vset.pattern.permute.xlu1 %v916_v2  ;;  %829 = vset.pattern.permute.xlu0 %v916_v2  ;;  %v268_v8 = vld [vmem:[%s1242_s2 + $0x10] sm:$0xff]  ;;  %v262_v13 = vld [vmem:[%s1241_s1] sm:$0xff]  ;;  %v380_v15 = vld [vmem:[%s1244_s4 + $0x18] sm:$0xff]  ;;  %p854_p13 = pnand %p853_p12, %p989_p4  ;;  %p859_p3 = por %p858_p2, %p857_p1 }
  0x16   : > { %277 = vperm.xlu1 %830, %v267_v0   ;;  %287 = vperm.xlu0 %829, %v269_v1   ;;  %s761_s12 = sshll.u32 %s245_s11, 6  ;;  %v379_v14 = vld [vmem:[%s1244_s4 + $0x10] sm:$0xff]  ;;  %v263_v16 = vld [vmem:[%s1241_s1 + $0x8] sm:$0xff]  ;;  %v265_v20 = vld [vmem:[%s1241_s1 + $0x18] sm:$0xff] }
  0x17   : > { %831 = vset.pattern.permute.xlu2 %v916_v2  ;;  %s251_s15 = scalar_lea.vmem %s1240_s0, %s761_s12  ;;  %v382_v17 = vld [vmem:[%s1244_s4 + $0x28] sm:$0xff]  ;;  %v383_v18 = vld [vmem:[%s1244_s4 + $0x30] sm:$0xff]  ;;  %v369_v49 = vld [vmem:[%s1243_s3] sm:$0xff]  ;;  %p855_p0 = pneg %p854_p13 }
  0x18   : > { %v260_v3 = vld [vmem:[%s251_s15 + $0x30] sm:$0xff]  ;;  %v261_v4 = vld [vmem:[%s251_s15 + $0x38] sm:$0xff]  ;;  %v258_v5 = vld [vmem:[%s251_s15 + $0x20] sm:$0xff] }
  0x19   : > { %315 = vmatpush.msra.mxu0 %v260_v3  ;;  %344 = vmatpush.msra.mxu1 %v261_v4  ;;  %v259_v6 = vld [vmem:[%s251_s15 + $0x28] sm:$0xff]  ;;  %v256_v9 = vld [vmem:[%s251_s15 + $0x10] sm:$0xff]  ;;  %v257_v10 = vld [vmem:[%s251_s15 + $0x18] sm:$0xff]  ;;  %p860_p5 = pnand %p859_p3, %p855_p0 }
  0x1a   : > { %v254_v11 = vld [vmem:[%s251_s15] sm:$0xff]  ;;  %v255_v12 = vld [vmem:[%s251_s15 + $0x8] sm:$0xff]  ;;  %v264_v19 = vld [vmem:[%s1241_s1 + $0x10] sm:$0xff]  ;;  %s240_s15 = sand.u32 1, %s898_s19  }
  0x1b   : > { %316 = vmatpush.msra.mxu0 %v258_v5  ;;  %345 = vmatpush.msra.mxu1 %v259_v6  ;;  %v371_v50 = vld [vmem:[%s1243_s3 + $0x10] sm:$0xff]  ;;  %v377_v51 = vld [vmem:[%s1244_s4] sm:$0xff]  ;;  %v370_v52 = vld [vmem:[%s1243_s3 + $0x8] sm:$0xff]  ;;  %s729_s16 = sshll.u32 %s240_s15, 7  ;;  %s628_s8 = scalar_lea.sflag [#allocation3], %s240_s15 }
  0x1c   : > { %387 = vperm.xlu2 %831, %v377_v51   ;;  %v372_v53 = vld [vmem:[%s1243_s3 + $0x18] sm:$0xff]  ;;  %v378_v54 = vld [vmem:[%s1244_s4 + $0x8] sm:$0xff]  ;;  %v373_v55 = vld [vmem:[%s1243_s3 + $0x20] sm:$0xff]  ;;  %s1173_s17 = scalar_lea.vmem [#allocation2], %s729_s16 }
  0x1d   : > { %317 = vmatpush.msra.mxu0 %v256_v9  ;;  %346 = vmatpush.msra.mxu1 %v257_v10  ;;  %v381_v56 = vld [vmem:[%s1244_s4 + $0x20] sm:$0xff]  ;;  %v374_v57 = vld [vmem:[%s1243_s3 + $0x28] sm:$0xff]  ;;  %v384_v58 = vld [vmem:[%s1244_s4 + $0x38] sm:$0xff]  ;;  %s642_s21 = sshll.u32 %s1173_s17, 4  ;;  %s643_s21 = int_to_ptr.vmem [resolvable:$true] %s642_s21 }
  0x1e   : > { %272 = vperm.xlu1 %830, %v266_v7   ;;  %282 = vperm.xlu0 %829, %v268_v8   ;;  %v375_v59 = vld [vmem:[%s1243_s3 + $0x30] sm:$0xff]  ;;  %v376_v60 = vld [vmem:[%s1243_s3 + $0x38] sm:$0xff] }
  0x1f   : > { %318 = vmatpush.msra.mxu0 %v254_v11  ;;  %347 = vmatpush.msra.mxu1 %v255_v12 }
  0x20   : > { %732 = vmatmul.msk.f32.vlgmr.msra.gmra.mxu0 %vm290_vm0, %v262_v13  ;;  %736 = vmatmul.msk.f32.vlgmr.msra.gmra.mxu1 %vm290_vm0, %v262_v13 }
  0x24   : > { %392 = vperm.xlu2 %831, %v378_v54  }
  0x26   : > { %397 = vperm.xlu0 %829, %v379_v14   ;;  %402 = vperm.xlu1 %830, %v380_v15  }
  0x28   : > { %733 = vmatmul.msk.f32.gmra.mxu0 %vm290_vm0, %v263_v16  ;;  %737 = vmatmul.msk.f32.gmra.mxu1 %vm290_vm0, %v263_v16 }
  0x2c   : > { %407 = vperm.xlu2 %831, %v381_v56  }
  0x2e   : > { %412 = vperm.xlu0 %829, %v382_v17   ;;  %417 = vperm.xlu1 %830, %v383_v18  }
  0x30   : > { %734 = vmatmul.msk.f32.gmra.mxu0 %vm290_vm0, %v264_v19  ;;  %738 = vmatmul.msk.f32.gmra.mxu1 %vm290_vm0, %v264_v19 }
  0x34   : > { %422 = vperm.xlu2 %831, %v384_v58  }
  0x38   : > { %735 = vmatmul.msk.f32.gmra.mxu0 %vm290_vm0, %v265_v20  ;;  %739 = vmatmul.msk.f32.gmra.mxu1 %vm290_vm0, %v265_v20 }
  0x76   : > { %v388_v1 = vpop.permute.xlu2 %387 }
  0x7e   : > { %v393_v6 = vpop.permute.xlu2 %392 }
  0x88   : > { %v288_v25 = vpop.permute.xlu0 %287  ;;  %v278_v26 = vpop.permute.xlu1 %277 }
  0x90   : > { %v283_v29 = vpop.permute.xlu0 %282  ;;  %v273_v35 = vpop.permute.xlu1 %272 }
  0x98   : > { %v398_v9 = vpop.permute.xlu0 %397  ;;  %v403_v12 = vpop.permute.xlu1 %402 }
  0x9d   : > { %v320_v21 = vpop.f32.mrf.mxu0  ;;  %v349_v22 = vpop.f32.mrf.mxu1 }
  0x9e   : > { %v321_v41 = vadd.f32 %v320_v21, %v273_v35  ;;  %v350_v43 = vadd.f32 %v349_v22, %v273_v35 }
  0xa0   : > { %v361_v47 = vmax.f32 %v321_v41, 0.0  ;;  %v362_v48 = vmax.f32 %v350_v43, 0.0 }
  0xa5   : > { %v323_v23 = vpop.f32.mrf.mxu0  ;;  %v352_v24 = vpop.f32.mrf.mxu1 }
  0xa6   : > { %v324_v37 = vadd.f32 %v323_v23, %v278_v26  ;;  %v353_v40 = vadd.f32 %v352_v24, %v278_v26  ;;  %v408_v24 = vpop.permute.xlu2 %407 }
  0xa8   : > { %v363_v45 = vmax.f32 %v324_v37, 0.0  ;;  %v364_v46 = vmax.f32 %v353_v40, 0.0 }
  0xad   : > { %v326_v27 = vpop.f32.mrf.mxu0  ;;  %v355_v28 = vpop.f32.mrf.mxu1 }
  0xae   : > { %v327_v32 = vadd.f32 %v326_v27, %v283_v29  ;;  %v356_v36 = vadd.f32 %v355_v28, %v283_v29  ;;  %v413_v28 = vpop.permute.xlu0 %412 }
  0xb0   : > { %v365_v42 = vmax.f32 %v327_v32, 0.0  ;;  %v366_v44 = vmax.f32 %v356_v36, 0.0  ;;  %v418_v36 = vpop.permute.xlu1 %417 }
  0xb5   : > { %v329_v30 = vpop.f32.mrf.mxu0  ;;  %v358_v31 = vpop.f32.mrf.mxu1 }
  0xb6   : > { %v330_v33 = vadd.f32 %v329_v30, %v288_v25  ;;  %v359_v34 = vadd.f32 %v358_v31, %v288_v25 }
  0xb8   : > { %v367_v38 = vmax.f32 %v330_v33, 0.0  ;;  %v368_v39 = vmax.f32 %v359_v34, 0.0 }
  0xba   : > { %461 = vmatpush.msrb.mxu0 %v367_v38  ;;  %763 = vmatpush.msra.mxu2 %v367_v38 }
  0xbb   : > { %502 = vmatpush.msrb.mxu1 %v368_v39  ;;  %767 = vmatpush.msra.mxu3 %v368_v39 }
  0xbc   : > { %462 = vmatpush.msrb.mxu0 %v365_v42  ;;  %764 = vmatpush.msra.mxu2 %v365_v42 }
  0xbd   : > { %503 = vmatpush.msrb.mxu1 %v366_v44  ;;  %768 = vmatpush.msra.mxu3 %v366_v44 }
  0xbe   : > { %463 = vmatpush.msrb.mxu0 %v363_v45  ;;  %765 = vmatpush.msra.mxu2 %v363_v45 }
  0xbf   : > { %504 = vmatpush.msrb.mxu1 %v364_v46  ;;  %769 = vmatpush.msra.mxu3 %v364_v46 }
  0xc0   : > { %464 = vmatpush.msrb.mxu0 %v361_v47  ;;  %766 = vmatpush.msra.mxu2 %v361_v47 }
  0xc1   : > { %505 = vmatpush.msrb.mxu1 %v362_v48  ;;  %770 = vmatpush.msra.mxu3 %v362_v48 }
  0xc2   : > { %740 = vmatmul.msk.f32.vlgmr.msrb.gmra.mxu0 %vm290_vm0, %v369_v49  ;;  %742 = vmatmul.msk.f32.vlgmr.msra.gmra.mxu2 %vm290_vm0, %v371_v50 }
  0xc3   : > { %748 = vmatmul.msk.f32.vlgmr.msrb.gmra.mxu1 %vm290_vm0, %v369_v49  ;;  %750 = vmatmul.msk.f32.vlgmr.msra.gmra.mxu3 %vm290_vm0, %v371_v50 }
  0xca   : > { %741 = vmatmul.msk.f32.gmra.mxu0 %vm290_vm0, %v370_v52  ;;  %743 = vmatmul.msk.f32.gmra.mxu2 %vm290_vm0, %v372_v53 }
  0xcb   : > { %749 = vmatmul.msk.f32.gmra.mxu1 %vm290_vm0, %v370_v52  ;;  %751 = vmatmul.msk.f32.gmra.mxu3 %vm290_vm0, %v372_v53  ;;  %v423_v52 = vpop.permute.xlu2 %422 }
  0xd2   : > { %744 = vmatmul.msk.f32.gmra.mxu2 %vm290_vm0, %v373_v55 }
  0xd3   : > { %752 = vmatmul.msk.f32.gmra.mxu3 %vm290_vm0, %v373_v55 }
  0xda   : > { %745 = vmatmul.msk.f32.gmra.mxu2 %vm290_vm0, %v374_v57 }
  0xdb   : > { %753 = vmatmul.msk.f32.gmra.mxu3 %vm290_vm0, %v374_v57 }
  0xe2   : > { %746 = vmatmul.msk.f32.gmra.mxu2 %vm290_vm0, %v375_v59 }
  0xe3   : > { %754 = vmatmul.msk.f32.gmra.mxu3 %vm290_vm0, %v375_v59 }
  0xea   : > { %747 = vmatmul.msk.f32.gmra.mxu2 %vm290_vm0, %v376_v60 }
  0xeb   : > { %755 = vmatmul.msk.f32.gmra.mxu3 %vm290_vm0, %v376_v60 }
 0x13f   : > { %v466_v2 = vpop.f32.mrf.mxu0 }
 0x140   : > { %v507_v3 = vpop.f32.mrf.mxu1  ;;  %v1105_v10 = vadd.f32 %v466_v2, %v388_v1 }
 0x141   : > { %v1109_v13 = vadd.f32 %v507_v3, %v388_v1 }
 0x142   : > { %v531_v17 = vmul.f32 %v1105_v10, %v1105_v10 }
 0x143   : > { %v532_v19 = vmul.f32 %v1109_v13, %v1109_v13 }
 0x145   : > { %v472_v61 = vpop.f32.mrf.mxu2 }
 0x146   : > { %v513_v62 = vpop.f32.mrf.mxu3  ;;  %v1121_v21 = vadd.f32 %v472_v61, %v398_v9 }
 0x147   : > { %v469_v7 = vpop.f32.mrf.mxu0  ;;  %v1125_v23 = vadd.f32 %v513_v62, %v398_v9 }
 0x148   : > { %v510_v8 = vpop.f32.mrf.mxu1  ;;  %v1107_v11 = vadd.f32 %v469_v7, %v393_v6  ;;  %v535_v32 = vmul.f32 %v1121_v21, %v1121_v21 }
 0x149   : > { %v1111_v14 = vadd.f32 %v510_v8, %v393_v6  ;;  %v536_v37 = vmul.f32 %v1125_v23, %v1125_v23 }
 0x14a   : > { %v533_v18 = vmul.f32 %v1107_v11, %v1107_v11 }
 0x14b   : > { %v534_v20 = vmul.f32 %v1111_v14, %v1111_v14 }
 0x14c   : > { %v547_v26 = vadd.f32 %v533_v18, %v531_v17 }
 0x14d   : > { %v475_v63 = vpop.f32.mrf.mxu2  ;;  %v560_v29 = vadd.f32 %v534_v20, %v532_v19 }
 0x14e   : > { %v516_v0 = vpop.f32.mrf.mxu3  ;;  %v1123_v22 = vadd.f32 %v475_v63, %v403_v12  ;;  %v548_v40 = vadd.f32 %v547_v26, %v535_v32 }
 0x14f   : > { %v1127_v25 = vadd.f32 %v516_v0, %v403_v12  ;;  %v561_v43 = vadd.f32 %v560_v29, %v536_v37 }
 0x150   : > { %v537_v33 = vmul.f32 %v1123_v22, %v1123_v22 }
 0x151   : > { %v538_v38 = vmul.f32 %v1127_v25, %v1127_v25 }
 0x152   : > { %v549_v46 = vadd.f32 %v548_v40, %v537_v33 }
 0x153   : > { %v562_v48 = vadd.f32 %v561_v43, %v538_v38 }
 0x155   : > { %v478_v4 = vpop.f32.mrf.mxu2 }
 0x156   : > { %v519_v5 = vpop.f32.mrf.mxu3  ;;  %v1129_v27 = vadd.f32 %v478_v4, %v408_v24 }
 0x157   : > { %v1131_v30 = vadd.f32 %v519_v5, %v408_v24 }
 0x158   : > { %v539_v41 = vmul.f32 %v1129_v27, %v1129_v27 }
 0x159   : > { %v540_v44 = vmul.f32 %v1131_v30, %v1131_v30 }
 0x15a   : > { %v550_v50 = vadd.f32 %v549_v46, %v539_v41 }
 0x15b   : > { %v563_v53 = vadd.f32 %v562_v48, %v540_v44 }
 0x15d   : > { %v481_v15 = vpop.f32.mrf.mxu2 }
 0x15e   : > { %v522_v16 = vpop.f32.mrf.mxu3  ;;  %v1137_v34 = vadd.f32 %v481_v15, %v413_v28 }
 0x15f   : > { %v1143_v39 = vadd.f32 %v522_v16, %v413_v28 }
 0x160   : > { %v541_v47 = vmul.f32 %v1137_v34, %v1137_v34 }
 0x161   : > { %v542_v49 = vmul.f32 %v1143_v39, %v1143_v39 }
 0x162   : > { %v551_v56 = vadd.f32 %v550_v50, %v541_v47 }
 0x163   : > { %v564_v59 = vadd.f32 %v563_v53, %v542_v49 }
 0x165   : > { %v484_v31 = vpop.f32.mrf.mxu2 }
 0x166   : > { %v525_v35 = vpop.f32.mrf.mxu3  ;;  %v1147_v42 = vadd.f32 %v484_v31, %v418_v36 }
 0x167   : > { %v1151_v45 = vadd.f32 %v525_v35, %v418_v36 }
 0x168   : > { %v543_v51 = vmul.f32 %v1147_v42, %v1147_v42 }
 0x169   : > { %v544_v54 = vmul.f32 %v1151_v45, %v1151_v45 }
 0x16a   : > { %v552_v61 = vadd.f32 %v551_v56, %v543_v51 }
 0x16b   : > { %v565_v63 = vadd.f32 %v564_v59, %v544_v54 }
 0x16d   : > { %v487_v55 = vpop.f32.mrf.mxu2 }
 0x16e   : > { %v488_v57 = vadd.f32 %v487_v55, %v423_v52  ;;  %v528_v58 = vpop.f32.mrf.mxu3 }
 0x16f   : > { %v1161_v60 = vadd.f32 %v528_v58, %v423_v52 }
 0x170   : > { %v545_v62 = vmul.f32 %v488_v57, %v488_v57 }
 0x171   : > { %v546_v0 = vmul.f32 %v1161_v60, %v1161_v60 }
 0x172   : > { %v553_v1 = vadd.f32 %v552_v61, %v545_v62 }
 0x173   : > { %v566_v2 = vadd.f32 %v565_v63, %v546_v0 }
 0x174   : > { %v554_v3 = vrot.slane %v553_v1, 4 }
 0x175   : > { %v567_v4 = vrot.slane %v566_v2, 4 }
 0x176   : > { %v555_v5 = vadd.f32 %v554_v3, %v553_v1 }
 0x177   : > { %v568_v6 = vadd.f32 %v567_v4, %v566_v2 }
 0x178   : > { %v556_v7 = vrot.slane %v555_v5, 2 }
 0x179   : > { %v569_v8 = vrot.slane %v568_v6, 2 }
 0x17a   : > { %v557_v9 = vadd.f32 %v556_v7, %v555_v5 }
 0x17b   : > { %v570_v12 = vadd.f32 %v569_v8, %v568_v6 }
 0x17c   : > { %v558_v15 = vrot.slane %v557_v9, 1 }
 0x17d   : > { %v571_v16 = vrot.slane %v570_v12, 1 }
 0x17e   : > { %v559_v17 = vadd.f32 %v558_v15, %v557_v9 }
 0x17f   : > { %v572_v18 = vadd.f32 %v571_v16, %v570_v12 }
 0x180   : > { %v573_v19 = vmax.f32 %v559_v17, 1e-24 }
 0x181   : > { %v574_v20 = vmax.f32 %v572_v18, 1e-24 }
 0x182   : > { %832 = vrsqrt.f32 %v573_v19  ;;  %vm581_vm2 = vweird.f32 %v573_v19 }
 0x183   : > { %834 = vrsqrt.f32 %v574_v20  ;;  %vm591_vm5 = vweird.f32 %v574_v20 }
 0x188   : > { %v833_v24 = vpop.eup %832 }
 0x189   : > { %v835_v26 = vpop.eup %834  ;;  %v576_v28 = vmul.f32 %v833_v24, %v573_v19  ;;  %vm582_vm1 = vweird.f32 %v833_v24 }
 0x18a   : > { %v586_v29 = vmul.f32 %v835_v26, %v574_v20  ;;  %vm583_vm3 = vmor %vm581_vm2, %vm582_vm1  ;;  %vm592_vm4 = vweird.f32 %v835_v26 }
 0x18b   : > { %v577_v31 = vmul.f32 %v833_v24, %v576_v28  ;;  %vm593_vm6 = vmor %vm591_vm5, %vm592_vm4 }
 0x18c   : > { %v587_v32 = vmul.f32 %v835_v26, %v586_v29 }
 0x18d   : > { %v578_v33 = vmul.f32 0.5, %v577_v31 }
 0x18e   : > { %v588_v35 = vmul.f32 0.5, %v587_v32 }
 0x18f   : > { %v579_v36 = vsub.f32 1.5, %v578_v33 }
 0x190   : > { %v589_v37 = vsub.f32 1.5, %v588_v35 }
 0x191   : > { %v580_v38 = vmul.f32 %v833_v24, %v579_v36 }
 0x192   : > { %v590_v41 = vmul.f32 %v835_v26, %v589_v37 }
 0x193   : > { %v584_v40 = vsel %vm583_vm3, %v833_v24, %v580_v38 }
 0x194   : > { %v595_v43 = vmul.f32 %v584_v40, %v1105_v10  ;;  %v597_v44 = vmul.f32 %v584_v40, %v1107_v11  ;;  %v599_v46 = vmul.f32 %v584_v40, %v1121_v21  ;;  %v601_v47 = vmul.f32 %v584_v40, %v1123_v22 }
 0x195   : > { %v603_v48 = vmul.f32 %v584_v40, %v1129_v27  ;;  %v605_v10 = vmul.f32 %v584_v40, %v1137_v34  ;;  %v594_v11 = vsel %vm593_vm6, %v835_v26, %v590_v41  ;;  %v607_v21 = vmul.f32 %v584_v40, %v1147_v42 }
 0x196   : > { %611 = vst [vmem:[%s1173_s17] sm:$0xff] %v595_v43  ;;  %v609_v22 = vmul.f32 %v584_v40, %v488_v57  ;;  %v596_v27 = vmul.f32 %v594_v11, %v1109_v13  ;;  %v598_v49 = vmul.f32 %v594_v11, %v1111_v14  ;;  %v600_v34 = vmul.f32 %v594_v11, %v1125_v23 }
 0x197   : > { %613 = vst [vmem:[%s1173_s17 + $0x10] sm:$0xff] %v597_v44  ;;  %v602_v42 = vmul.f32 %v594_v11, %v1127_v25  ;;  %v604_v13 = vmul.f32 %v594_v11, %v1131_v30  ;;  %v606_v14 = vmul.f32 %v594_v11, %v1143_v39  ;;  %v608_v23 = vmul.f32 %v594_v11, %v1151_v45 }
 0x198   : > { %615 = vst [vmem:[%s1173_s17 + $0x20] sm:$0xff] %v599_v46  ;;  %v610_v50 = vmul.f32 %v594_v11, %v1161_v60 }
 0x199   : > { %617 = vst [vmem:[%s1173_s17 + $0x30] sm:$0xff] %v601_v47 }
 0x19a   : > { %619 = vst [vmem:[%s1173_s17 + $0x40] sm:$0xff] %v603_v48 }
 0x19b   : > { %621 = vst [vmem:[%s1173_s17 + $0x50] sm:$0xff] %v605_v10 }
 0x19c   : > { %623 = vst [vmem:[%s1173_s17 + $0x60] sm:$0xff] %v607_v21 }
 0x19d   : > { %625 = vst [vmem:[%s1173_s17 + $0x70] sm:$0xff] %v609_v22 }
 0x19e   : > { %612 = vst [vmem:[%s1173_s17 + $0x8] sm:$0xff] %v596_v27 }
 0x19f   : > { %614 = vst [vmem:[%s1173_s17 + $0x18] sm:$0xff] %v598_v49 }
 0x1a0   : > { %616 = vst [vmem:[%s1173_s17 + $0x28] sm:$0xff] %v600_v34 }
 0x1a1   : > { %618 = vst [vmem:[%s1173_s17 + $0x38] sm:$0xff] %v602_v42 }
 0x1a2   : > { %620 = vst [vmem:[%s1173_s17 + $0x48] sm:$0xff] %v604_v13 }
 0x1a3   : > { %622 = vst [vmem:[%s1173_s17 + $0x58] sm:$0xff] %v606_v14 }
 0x1a4   : > { %624 = vst [vmem:[%s1173_s17 + $0x68] sm:$0xff] %v608_v23 }
 0x1a5   : > { %626 = vst [vmem:[%s1173_s17 + $0x78] sm:$0xff] %v610_v50 }
 0x1a6   : > { %863 = shalt.err (!%p860_p5)
}
 0x1a7   : > { %s917_s15 = smov 256   ;;  %s918_s17 = smov 16  }
 0x1a8   : > { %771 = dma.vmem_to_hbm [thread:$0]  (%p989_p4), %s643_s21, 2048, %s645_s7, %s628_s8, %s917_s15, %s917_s15, %s918_s17  }
 0x1a9 PF: > { %p777_p6 = scmp.ge.s32.totalorder %s914_s23, 2  ;;  %s659_s24 = sand.u32 1, %s894_s18  }
 0x1aa   : > { %s660_s25 = scalar_lea.sflag [#allocation3], %s659_s24 }
 0x1ab   : > { %p774_p7 = pnand %p777_p6, %p996_p8 }
 0x1ad   : > { %p775_p9 = pneg %p774_p7 }
 0x1af   : > { %889 = dma.done.wait (%p775_p9), %s660_s25, 2048  }
 0x1b0   : > { %891 = vsyncadd (%p775_p9), %s660_s25, 4294965248  ;;  %s18_s23 = sadd.s32 1, %s914_s23   ;;  %s1248_s18 = smov %s898_s19 }
 0x1b1   : > { %p15_p10 = scmp.ge.s32.totalorder %s18_s23, 4   ;;  %s1249_s19 = smov %s902_s20 }
 0x1b2   : > { %s1250_s20 = smov %s1002_s6  ;;  %s1251_s21 = smov %s910_s22 }
 0x1b3   : > { %s1252_s22 = smov %s1254_s26  ;;  %17 = sbr.rel (!%p15_p10) target bundleno = 4 (0x4), region = 75 }
 0x1b8   :  { %666 = vsyncpa [#allocation3], 1 }
 0x1b9   :  { %668 = vsyncpa [#allocation3 + $0x1], 1 }

</bundles_post_ra>
